<compile_context>
chip_gen: v7x
topology: tpu7x:2x2x1
jax: 0.10.0
libtpu: 0.0.40
codegen_flags: <defaults>
</compile_context>

<pallas_src>
import numpy as np

import jax
import jax.numpy as jnp
from jax import lax
from jax.experimental import pallas as pl
from jax.experimental.pallas import tpu as pltpu

EPS = 1e-6


def _default_vmem_limit():
    # v5e / v6e have 128 MiB VMEM per core, v7x only 64 MiB: derive the scoped
    # limit from the hardware so large tiles stay safe everywhere.
    try:
        cap = pltpu.get_tpu_info().vmem_capacity_bytes
        return int(min(cap * 6 // 10, 64 * 1024 * 1024))
    except Exception:
        return 40 * 1024 * 1024


_VMEM_LIMIT = _default_vmem_limit()


def _tile(dim, target, align):
    """Largest block size <= target dividing `dim` that is a multiple of
    `align` (or, failing that, the full dim — always a legal block)."""
    if dim <= target:
        return dim
    for cand in range(min(target, dim), 0, -1):
        if dim % cand == 0 and cand % align == 0:
            return cand
    return dim


# ----------------------------------------------------------------------------
# Kernel 1: tiled matmul with K-accumulation (fused q|k|v|gate projection)
#   bf16 operands, f32 VMEM accumulator, output stored only on the last K step.
# ----------------------------------------------------------------------------
def _matmul_kernel(x_ref, w_ref, o_ref, acc_ref):
    @pl.when(pl.program_id(2) == 0)
    def _():
        acc_ref[...] = jnp.zeros_like(acc_ref)

    acc_ref[...] += jnp.dot(
        x_ref[...].astype(jnp.bfloat16),
        w_ref[...].astype(jnp.bfloat16),
        preferred_element_type=jnp.float32,
    )

    @pl.when(pl.program_id(2) == pl.num_programs(2) - 1)
    def _():
        o_ref[...] = acc_ref[...].astype(o_ref.dtype)


def matmul(x, w, *, bm=256, bn=512, bk=512, out_dtype=None):
    M, K = x.shape
    K2, N = w.shape
    assert K == K2
    out_dtype = out_dtype or x.dtype
    bm = _tile(M, bm, 8)
    bn = _tile(N, bn, 128)
    bk = _tile(K, bk, 128)
    return pl.pallas_call(
        _matmul_kernel,
        out_shape=jax.ShapeDtypeStruct((M, N), out_dtype),
        grid_spec=pltpu.PrefetchScalarGridSpec(
            num_scalar_prefetch=0,
            grid=(M // bm, N // bn, K // bk),
            in_specs=[
                pl.BlockSpec((bm, bk), lambda i, j, k: (i, k)),
                pl.BlockSpec((bk, bn), lambda i, j, k: (k, j)),
            ],
            out_specs=pl.BlockSpec((bm, bn), lambda i, j, k: (i, j)),
            scratch_shapes=[pltpu.VMEM((bm, bn), jnp.float32)],
        ),
        compiler_params=pltpu.CompilerParams(
            dimension_semantics=("parallel", "parallel", "arbitrary"),
            vmem_limit_bytes=_VMEM_LIMIT,
        ),
    )(x, w)


# ----------------------------------------------------------------------------
# Kernel 2: chunked causal linear attention with fused silu + cosine-LRPE.
#   grid = (B*H, num_chunks); chunk axis sequential ("arbitrary"); the running
#   state lives in a single (2*dh, dh) f32 VMEM scratch; LRPE phases are packed
#   into (C, 2*dh) bf16 operands (one K=2*dh MXU contraction); causal mask is
#   built once per (b, h) row.
# ----------------------------------------------------------------------------
def _lin_attn_kernel(q_ref, k_ref, v_ref, cos_ref, sin_ref, o_ref,
                     s_ref, mask_ref, ql_ref, kl_ref):
    c = pl.program_id(1)
    dh = q_ref.shape[2]

    @pl.when(c == 0)
    def _():
        s_ref[...] = jnp.zeros_like(s_ref)
        C = mask_ref.shape[0]
        row = lax.broadcasted_iota(jnp.int32, (C, C), 0)
        col = lax.broadcasted_iota(jnp.int32, (C, C), 1)
        mask_ref[...] = (row >= col).astype(jnp.float32)

    # Elementwise silu / LRPE phases in f32; matmul operands packed as bf16.
    q = jax.nn.silu(q_ref[0].astype(jnp.float32))           # (C, dh)
    k = jax.nn.silu(k_ref[0].astype(jnp.float32))           # (C, dh)
    cos = cos_ref[0].astype(jnp.float32)
    sin = sin_ref[0].astype(jnp.float32)

    ql_ref[:, :dh] = (q * cos).astype(ql_ref.dtype)
    ql_ref[:, dh:] = (q * sin).astype(ql_ref.dtype)
    kl_ref[:, :dh] = (k * cos).astype(kl_ref.dtype)
    kl_ref[:, dh:] = (k * sin).astype(kl_ref.dtype)

    ql = ql_ref[...]                                         # (C, 2*dh) bf16
    kl = kl_ref[...]                                         # (C, 2*dh) bf16
    v = v_ref[0].astype(jnp.bfloat16)                        # (C, dh)

    # intra-chunk: causally masked quadratic attention (decay == 1).
    scores = lax.dot_general(
        ql, kl, (((1,), (1,)), ((), ())), preferred_element_type=jnp.float32
    ) * mask_ref[...]                                        # (C, C)
    intra = jnp.dot(scores.astype(jnp.bfloat16), v,
                    preferred_element_type=jnp.float32)

    # inter-chunk: contribution of the running state.
    inter = jnp.dot(ql, s_ref[...].astype(jnp.bfloat16),
                    preferred_element_type=jnp.float32)

    o_ref[0] = (intra + inter).astype(o_ref.dtype)

    # state update: S += [k*cos | k*sin]^T v   (f32 accumulator).
    s_ref[...] += lax.dot_general(
        kl, v, (((0,), (0,)), ((), ())), preferred_element_type=jnp.float32
    )


def _attention_call(arrays, in_specs, out_shape, out_spec, grid, chunk, dh):
    return pl.pallas_call(
        _lin_attn_kernel,
        out_shape=out_shape,
        grid_spec=pltpu.PrefetchScalarGridSpec(
            num_scalar_prefetch=0,
            grid=grid,
            in_specs=in_specs,
            out_specs=out_spec,
            scratch_shapes=[
                pltpu.VMEM((2 * dh, dh), jnp.float32),     # running state
                pltpu.VMEM((chunk, chunk), jnp.float32),   # causal mask
                pltpu.VMEM((chunk, 2 * dh), jnp.bfloat16), # q * [cos|sin]
                pltpu.VMEM((chunk, 2 * dh), jnp.bfloat16), # k * [cos|sin]
            ],
        ),
        compiler_params=pltpu.CompilerParams(
            dimension_semantics=("parallel", "arbitrary"),
            vmem_limit_bytes=_VMEM_LIMIT,
        ),
    )(*arrays)


def causal_linear_attention_fused(qkvg, cos, sin, *, num_heads, head_dim,
                                  chunk=256):
    """Production layout (head_dim % 128 == 0): heads are picked straight out
    of the fused (B, N, 3D+dh) projection output via index_maps and the output
    is written directly in merged (B, N, D) layout (no XLA head transposes)."""
    B, N, _ = qkvg.shape
    H, dh = num_heads, head_dim
    D = H * dh
    chunk = _tile(N, chunk, 8)
    nc = N // chunk
    blk = (1, chunk, dh)

    q_spec = pl.BlockSpec(blk, lambda i, c: (i // H, c, i % H))
    k_spec = pl.BlockSpec(blk, lambda i, c: (i // H, c, H + i % H))
    v_spec = pl.BlockSpec(blk, lambda i, c: (i // H, c, 2 * H + i % H))
    cs_spec = pl.BlockSpec(blk, lambda i, c: (i % H, c, 0))
    o_spec = pl.BlockSpec(blk, lambda i, c: (i // H, c, i % H))

    return _attention_call(
        (qkvg, qkvg, qkvg, cos, sin),
        [q_spec, k_spec, v_spec, cs_spec, cs_spec],
        jax.ShapeDtypeStruct((B, N, D), jnp.bfloat16),
        o_spec, (B * H, nc), chunk, dh)


def causal_linear_attention(q, k, v, cos, sin, *, num_heads, chunk=256):
    """Fallback for toy head dims: q, k, v already head-split (B*H, N, dh)."""
    BH, N, dh = q.shape
    H = num_heads
    chunk = _tile(N, chunk, 8)
    nc = N // chunk
    blk = (1, chunk, dh)
    qspec = pl.BlockSpec(blk, lambda i, c: (i, c, 0))
    cspec = pl.BlockSpec(blk, lambda i, c: (i % H, c, 0))
    return _attention_call(
        (q, k, v, cos, sin),
        [qspec, qspec, qspec, cspec, cspec],
        jax.ShapeDtypeStruct((BH, N, dh), jnp.bfloat16),
        qspec, (BH, nc), chunk, dh)


# ----------------------------------------------------------------------------
# Kernel 3: fused [gate 2nd matmul] + sigmoid-gated RMSNorm + output projection
#   y = rmsnorm(o * sigmoid(g1 @ wg2)) * norm_w ;  out = y @ wo
#   The gate/norm part is computed once per row tile into a VMEM scratch at
#   j == 0 and reused for every output-column tile (j axis "arbitrary").
# ----------------------------------------------------------------------------
def _gated_norm_oproj_kernel(o_ref, g1_ref, wg2_ref, nw_ref, wo_ref,
                             out_ref, y_ref):
    @pl.when(pl.program_id(1) == 0)
    def _():
        o = o_ref[...].astype(jnp.float32)
        gate = jnp.dot(
            g1_ref[...].astype(jnp.bfloat16),
            wg2_ref[...].astype(jnp.bfloat16),
            preferred_element_type=jnp.float32,
        )                                                    # (bm, D)
        z = o * jax.nn.sigmoid(gate)
        ms = jnp.mean(z * z, axis=-1, keepdims=True)
        y = z * lax.rsqrt(ms + EPS) * nw_ref[...].astype(jnp.float32)
        y_ref[...] = y.astype(y_ref.dtype)

    out_ref[...] = jnp.dot(
        y_ref[...], wo_ref[...].astype(jnp.bfloat16),
        preferred_element_type=jnp.float32,
    ).astype(out_ref.dtype)


def gated_norm_oproj(o, g1_src, g1_col, wg2, norm_w, wo, *, bm=256, bn=512,
                     out_dtype=jnp.float32):
    M, D = o.shape
    dh = wg2.shape[0]
    Dout = wo.shape[1]
    bm = _tile(M, bm, 8)
    bn = _tile(Dout, bn, 128)
    # TODO(synk): for very large D on v7x (64 MiB VMEM) the untiled-D o / wo
    #             blocks should additionally be K-tiled like kernel 1.
    return pl.pallas_call(
        _gated_norm_oproj_kernel,
        out_shape=jax.ShapeDtypeStruct((M, Dout), out_dtype),
        grid_spec=pltpu.PrefetchScalarGridSpec(
            num_scalar_prefetch=0,
            grid=(M // bm, Dout // bn),
            in_specs=[
                pl.BlockSpec((bm, D), lambda i, j: (i, 0)),
                pl.BlockSpec((bm, dh), lambda i, j: (i, g1_col)),
                pl.BlockSpec((dh, D), lambda i, j: (0, 0)),
                pl.BlockSpec((1, D), lambda i, j: (0, 0)),
                pl.BlockSpec((D, bn), lambda i, j: (0, j)),
            ],
            out_specs=pl.BlockSpec((bm, bn), lambda i, j: (i, j)),
            scratch_shapes=[pltpu.VMEM((bm, D), jnp.bfloat16)],
        ),
        compiler_params=pltpu.CompilerParams(
            # j must stay "arbitrary": the y scratch carries across column tiles.
            dimension_semantics=("parallel", "arbitrary"),
            vmem_limit_bytes=_VMEM_LIMIT,
        ),
    )(o, g1_src, wg2, norm_w.reshape(1, D), wo)


# ----------------------------------------------------------------------------
# Parameter init (deterministic, synthetic), LRPE tables, full forward wrapper
# ----------------------------------------------------------------------------
def init_params(key, embed_dim, num_heads, init_std=0.02):
    dh = embed_dim // num_heads
    ks = jax.random.split(key, 6)

    def w(k, shape):  # weights stored in (in, out) orientation for x @ W
        return init_std * jax.random.normal(k, shape, jnp.float32)

    wq = w(ks[0], (embed_dim, embed_dim))
    wk = w(ks[1], (embed_dim, embed_dim))
    wv = w(ks[2], (embed_dim, embed_dim))
    wo = w(ks[3], (embed_dim, embed_dim))
    wg1 = w(ks[4], (embed_dim, dh))
    wg2 = w(ks[5], (dh, embed_dim))
    return dict(
        wq=wq, wk=wk, wv=wv, wo=wo, wg1=wg1, wg2=wg2,
        # fused q|k|v|gate1 projection weight, stored bf16 for the MXU
        w_qkvg=jnp.concatenate([wq, wk, wv, wg1], axis=1).astype(jnp.bfloat16),
        wg2_bf16=wg2.astype(jnp.bfloat16),
        wo_bf16=wo.astype(jnp.bfloat16),
        norm_w=jnp.ones((embed_dim,), jnp.float32),
    )


def lrpe_tables(n, num_heads, head_dim, base=10000.0, dtype=jnp.bfloat16):
    d = num_heads * head_dim
    theta = (base ** (-2.0 / d * jnp.arange(d, dtype=jnp.float32))).reshape(
        num_heads, 1, head_dim
    )
    pos = jnp.arange(n, dtype=jnp.float32).reshape(1, n, 1)
    ang = theta * pos                       # (h, n, dh) — NOT tiled over batch
    return jnp.cos(ang).astype(dtype), jnp.sin(ang).astype(dtype)


def linear_attention_forward(params, x, num_heads, base=10000.0, chunk=256,
                             proj_bk=512, oproj_bn=512):
    b, n, d = x.shape
    h = num_heads
    dh = d // h
    xf = x.reshape(b * n, d)

    # Fused q/k/v/gate1 projection: x is read from HBM once.
    qkvg = matmul(xf, params["w_qkvg"], bk=proj_bk,
                  out_dtype=jnp.bfloat16)                     # (b*n, 3d + dh)

    cos, sin = lrpe_tables(n, h, dh, base)                    # (h, n, dh) bf16

    if dh % 128 == 0:
        # Production layout: head split/merge absorbed into BlockSpecs.
        qkvg3 = qkvg.reshape(b, n, 3 * d + dh)
        o = causal_linear_attention_fused(qkvg3, cos, sin, num_heads=h,
                                          head_dim=dh, chunk=chunk)
        o2 = o.reshape(b * n, d)
        g1_src, g1_col = qkvg, 3 * h       # gate1 block read straight from qkvg
    else:
        # TODO(synk): toy head_dim < 128 — explicit XLA head split/merge copies.
        q = qkvg[:, :d]
        k = qkvg[:, d:2 * d]
        v = qkvg[:, 2 * d:3 * d]

        def to_heads(t):                   # (b*n, d) -> (b*h, n, dh)
            return t.reshape(b, n, h, dh).transpose(0, 2, 1, 3).reshape(
                b * h, n, dh)

        q, k, v = map(to_heads, (q, k, v))
        o = causal_linear_attention(q, k, v, cos, sin, num_heads=h, chunk=chunk)
        o2 = o.reshape(b, h, n, dh).transpose(0, 2, 1, 3).reshape(b * n, d)
        g1_src, g1_col = qkvg[:, 3 * d:], 0

    out = gated_norm_oproj(o2, g1_src, g1_col, params["wg2_bf16"],
                           params["norm_w"], params["wo_bf16"],
                           bn=oproj_bn, out_dtype=x.dtype)
    return out.reshape(b, n, d)


# ----------------------------------------------------------------------------
# Pure-JAX f32 reference (quadratic masked form) for a sanity check
# ----------------------------------------------------------------------------
def reference_forward(params, x, num_heads, base=10000.0):
    b, n, d = x.shape
    h = num_heads
    dh = d // h
    q = x @ params["wq"]
    k = x @ params["wk"]
    v = x @ params["wv"]

    def heads(t):
        return t.reshape(b, n, h, dh).transpose(0, 2, 1, 3)   # (b,h,n,dh)

    q, k, v = heads(q), heads(k), heads(v)
    q, k = jax.nn.silu(q), jax.nn.silu(k)

    theta = (base ** (-2.0 / d * jnp.arange(d, dtype=jnp.float32))).reshape(
        h, 1, dh
    )
    pos = jnp.arange(n, dtype=jnp.float32).reshape(1, n, 1)
    ang = (theta * pos)[None]                                  # (1,h,n,dh)
    ql = jnp.concatenate([q * jnp.cos(ang), q * jnp.sin(ang)], axis=-1)
    kl = jnp.concatenate([k * jnp.cos(ang), k * jnp.sin(ang)], axis=-1)

    scores = jnp.einsum("bhme,bhne->bhmn", ql, kl)
    mask = jnp.tril(jnp.ones((n, n), bool))
    scores = jnp.where(mask, scores, 0.0)
    o = jnp.einsum("bhmn,bhnd->bhmd", scores, v)
    o = o.transpose(0, 2, 1, 3).reshape(b, n, d)

    gate = (x @ params["wg1"]) @ params["wg2"]
    z = o * jax.nn.sigmoid(gate)
    ms = jnp.mean(z * z, axis=-1, keepdims=True)
    y = z * lax.rsqrt(ms + EPS) * params["norm_w"]
    return y @ params["wo"]


if __name__ == "__main__":
    key = jax.random.PRNGKey(0)
    configs = [
        # (batch, seq, embed_dim, num_heads, chunk, proj_bk, oproj_bn)
        (2, 64, 32, 2, 16, 512, 512),   # toy dh=16  -> fallback split/merge path
        (2, 64, 256, 2, 16, 128, 128),  # dh=128     -> fused head-in-BlockSpec path
    ]
    for (b, n, d, h, chunk, proj_bk, oproj_bn) in configs:
        kx, kp, key = jax.random.split(key, 3)
        x = jax.random.normal(kx, (b, n, d), jnp.float32)
        params = init_params(kp, d, h)

        out = linear_attention_forward(params, x, h, chunk=chunk,
                                       proj_bk=proj_bk, oproj_bn=oproj_bn)
        out = jax.block_until_ready(out)

        assert out.shape == (b, n, d)
        assert bool(jnp.all(jnp.isfinite(out)))

        ref = reference_forward(params, x, h)
        np.testing.assert_allclose(
            np.asarray(out), np.asarray(ref), rtol=5e-2, atol=2e-2
        )

    print("KERNEL_OK")
</pallas_src>

<mosaic_0001>
module attributes {stable_mosaic.version = 11 : i64} {
  func.func @_matmul_kernel(%arg0: i32, %arg1: i32, %arg2: i32, %arg3: memref<128x32xf32, #tpu.memory_space<vmem>>, %arg4: memref<32x112xbf16, #tpu.memory_space<vmem>>, %arg5: memref<128x112xbf16, #tpu.memory_space<vmem>>, %arg6: memref<128x112xf32, #tpu.memory_space<vmem>>) attributes {dimension_semantics = [#tpu.dimension_semantics<parallel>, #tpu.dimension_semantics<parallel>, #tpu.dimension_semantics<arbitrary>], iteration_bounds = array<i64: 1, 1, 1>, scalar_prefetch = 0 : i64, scratch_operands = 1 : i64, tpu.core_type = #tpu.core_type<tc>, window_params = [{transform_indices = @transform_0, window_bounds = array<i64: 128, 32>}, {transform_indices = @transform_1, window_bounds = array<i64: 32, 112>}, {transform_indices = @transform_2, window_bounds = array<i64: 128, 112>}]} {
    %c0_i32 = arith.constant 0 : i32
    %0 = arith.cmpi eq, %arg2, %c0_i32 : i32
    %1 = arith.extui %0 : i1 to i32
    %c0_i32_0 = arith.constant 0 : i32
    %2 = arith.cmpi ne, %1, %c0_i32_0 : i32
    scf.if %2 {
      %cst_10 = arith.constant 0.000000e+00 : f32
      %13 = vector.broadcast %cst_10 : f32 to vector<128x112xf32>
      %c0_11 = arith.constant 0 : index
      %c0_12 = arith.constant 0 : index
      %14 = vector.load %arg6[%c0_11, %c0_12] : memref<128x112xf32, #tpu.memory_space<vmem>>, vector<128x112xf32>
      tpu.vector_store %arg6[%c0_11, %c0_12], %13 {strides = array<i32>} : memref<128x112xf32, #tpu.memory_space<vmem>>, vector<128x112xf32>,
    } else {
    }
    %c0 = arith.constant 0 : index
    %c0_1 = arith.constant 0 : index
    %3 = vector.load %arg6[%c0, %c0_1] : memref<128x112xf32, #tpu.memory_space<vmem>>, vector<128x112xf32>
    %c0_2 = arith.constant 0 : index
    %c0_3 = arith.constant 0 : index
    %4 = vector.load %arg3[%c0_2, %c0_3] : memref<128x32xf32, #tpu.memory_space<vmem>>, vector<128x32xf32>
    %5 = arith.truncf %4 : vector<128x32xf32> to vector<128x32xbf16>
    %c0_4 = arith.constant 0 : index
    %c0_5 = arith.constant 0 : index
    %6 = vector.load %arg4[%c0_4, %c0_5] : memref<32x112xbf16, #tpu.memory_space<vmem>>, vector<32x112xbf16>
    %cst = arith.constant dense<0.000000e+00> : vector<128x112xf32>
    %7 = tpu.matmul %5, %6, %cst {dimension_numbers = #tpu.dot_dimension_numbers<[1], [0], [0], [1], [0, 0, 1, 1], [], []>} : vector<128x32xbf16>, vector<32x112xbf16>, vector<128x112xf32> -> vector<128x112xf32>
    %8 = arith.addf %3, %7 : vector<128x112xf32>
    %c0_6 = arith.constant 0 : index
    %c0_7 = arith.constant 0 : index
    %9 = vector.load %arg6[%c0_6, %c0_7] : memref<128x112xf32, #tpu.memory_space<vmem>>, vector<128x112xf32>
    tpu.vector_store %arg6[%c0_6, %c0_7], %8 {strides = array<i32>} : memref<128x112xf32, #tpu.memory_space<vmem>>, vector<128x112xf32>,
    %c0_i32_8 = arith.constant 0 : i32
    %10 = arith.cmpi eq, %arg2, %c0_i32_8 : i32
    %11 = arith.extui %10 : i1 to i32
    %c0_i32_9 = arith.constant 0 : i32
    %12 = arith.cmpi ne, %11, %c0_i32_9 : i32
    scf.if %12 {
      %c0_10 = arith.constant 0 : index
      %c0_11 = arith.constant 0 : index
      %13 = vector.load %arg6[%c0_10, %c0_11] : memref<128x112xf32, #tpu.memory_space<vmem>>, vector<128x112xf32>
      %14 = arith.truncf %13 : vector<128x112xf32> to vector<128x112xbf16>
      %c0_12 = arith.constant 0 : index
      %c0_13 = arith.constant 0 : index
      %15 = vector.load %arg5[%c0_12, %c0_13] : memref<128x112xbf16, #tpu.memory_space<vmem>>, vector<128x112xbf16>
      tpu.vector_store %arg5[%c0_12, %c0_13], %14 {strides = array<i32>} : memref<128x112xbf16, #tpu.memory_space<vmem>>, vector<128x112xbf16>,
    } else {
    }
    return
  }
  func.func @transform_0(%arg0: i32, %arg1: i32, %arg2: i32) -> (i32, i32) {
    %c0_i32 = arith.constant 0 : i32
    return %arg0, %arg2 : i32, i32
  }
  func.func @transform_1(%arg0: i32, %arg1: i32, %arg2: i32) -> (i32, i32) {
    %c0_i32 = arith.constant 0 : i32
    return %arg2, %arg1 : i32, i32
  }
  func.func @transform_2(%arg0: i32, %arg1: i32, %arg2: i32) -> (i32, i32) {
    %c0_i32 = arith.constant 0 : i32
    return %arg0, %arg1 : i32, i32
  }
}

</mosaic_0001>

<bundles_post_ra>
// kernel: tpu_custom_call.1
= control target key start
LH: loop header
LB: loop body
LE: loop exit
PB: predicated region body
PF: predicated region fallthrough
CT: control target
= control target key end

     0   :  { %vm16_vm0 = vcmask 916480   ;;  %v427_v1 = vmov 0.0   ;;  %vm89_vm1 = vcmask 261120   ;;  %vm327_vm2 = vcmask 912384   ;;  %s601_s1 = inlined_call_operand.vmem [shape: bf16[32,112], index: 1, kind: input, shape index: {}]   ;;  %s602_s0 = inlined_call_operand.vmem [shape: f32[128,32], index: 0, kind: input, shape index: {}]   ;;  %s603_s2 = inlined_call_operand.vmem [shape: bf16[128,112], index: 2, kind: output, shape index: {}]  }
   0x1   :  { %v425_v0 = vld [vmem:[%s601_s1] sm:$0xff]   ;;  %19 = vst.msk [vmem:[#allocation2 + $0x10] sm:$0xff] %vm16_vm0, %v427_v1  ;;  %17 = vst.msk [vmem:[#allocation2] sm:$0xff] %vm16_vm0, %v427_v1  ;;  %v426_v2 = vld [vmem:[%s601_s1 + $0x8] sm:$0xff]  }
   0x2   :  { %18 = vst.msk [vmem:[#allocation2 + $0x8] sm:$0xff] %vm16_vm0, %v427_v1  ;;  %20 = vst.msk [vmem:[#allocation2 + $0x18] sm:$0xff] %vm16_vm0, %v427_v1  ;;  %400 = vmatprep.subr.bf16.mxu0 %v425_v0  ;;  %420 = vmatprep.subr.bf16.mxu1 %v425_v0  ;;  %v49_v3 = vld [vmem:[%s602_s0] sm:$0xff]  ;;  %v50_v4 = vld [vmem:[%s602_s0 + $0x8] sm:$0xff] }
   0x3   :  { %21 = vst.msk [vmem:[#allocation2 + $0x20] sm:$0xff] %vm16_vm0, %v427_v1  ;;  %22 = vst.msk [vmem:[#allocation2 + $0x28] sm:$0xff] %vm16_vm0, %v427_v1  ;;  %v57_v5 = vld [vmem:[%s602_s0 + $0x40] sm:$0xff]  ;;  %401 = vmatpush3.bf16.msra.mxu0 %v425_v0  ;;  %422 = vmatpush3.bf16.msra.mxu1 %v425_v0  ;;  %v65_v6 = vpack.c.bf16 %v50_v4, %v49_v3  ;;  %v58_v7 = vld [vmem:[%s602_s0 + $0x48] sm:$0xff] }
   0x4   :  { %23 = vst.msk [vmem:[#allocation2 + $0x30] sm:$0xff] %vm16_vm0, %v427_v1  ;;  %24 = vst.msk [vmem:[#allocation2 + $0x38] sm:$0xff] %vm16_vm0, %v427_v1  ;;  %v51_v8 = vld [vmem:[%s602_s0 + $0x10] sm:$0xff]  ;;  %v52_v9 = vld [vmem:[%s602_s0 + $0x18] sm:$0xff]  ;;  %402 = vmatprep.subr.bf16.mxu0 %v426_v2  ;;  %421 = vmatprep.subr.bf16.mxu1 %v426_v2  ;;  %v69_v10 = vpack.c.bf16 %v58_v7, %v57_v5 }
   0x5   :  { %25 = vst.msk [vmem:[#allocation2 + $0x40] sm:$0xff] %vm16_vm0, %v427_v1  ;;  %26 = vst.msk [vmem:[#allocation2 + $0x48] sm:$0xff] %vm16_vm0, %v427_v1  ;;  %v59_v11 = vld [vmem:[%s602_s0 + $0x50] sm:$0xff]  ;;  %v60_v12 = vld [vmem:[%s602_s0 + $0x58] sm:$0xff]  ;;  %404 = vmatprep.mubr.msk.bf16.mxu0 %vm89_vm1, %v65_v6  ;;  %v66_v17 = vpack.c.bf16 %v52_v9, %v51_v8 }
   0x6   :  { %27 = vst.msk [vmem:[#allocation2 + $0x50] sm:$0xff] %vm16_vm0, %v427_v1  ;;  %28 = vst.msk [vmem:[#allocation2 + $0x58] sm:$0xff] %vm16_vm0, %v427_v1  ;;  %v53_v13 = vld [vmem:[%s602_s0 + $0x20] sm:$0xff]  ;;  %v54_v14 = vld [vmem:[%s602_s0 + $0x28] sm:$0xff]  ;;  %412 = vmatprep.mubr.msk.bf16.mxu1 %vm89_vm1, %v69_v10  ;;  %v70_v18 = vpack.c.bf16 %v60_v12, %v59_v11 }
   0x7   :  { %29 = vst.msk [vmem:[#allocation2 + $0x60] sm:$0xff] %vm16_vm0, %v427_v1  ;;  %30 = vst.msk [vmem:[#allocation2 + $0x68] sm:$0xff] %vm16_vm0, %v427_v1  ;;  %v61_v15 = vld [vmem:[%s602_s0 + $0x60] sm:$0xff]  ;;  %v62_v16 = vld [vmem:[%s602_s0 + $0x68] sm:$0xff]  ;;  %403 = vmatpush3.bf16.msra.mxu0 %v426_v2  ;;  %423 = vmatpush3.bf16.msra.mxu1 %v426_v2  ;;  %v67_v19 = vpack.c.bf16 %v54_v14, %v53_v13 }
   0x8   :  { %31 = vst.msk [vmem:[#allocation2 + $0x70] sm:$0xff] %vm16_vm0, %v427_v1  ;;  %32 = vst.msk [vmem:[#allocation2 + $0x78] sm:$0xff] %vm16_vm0, %v427_v1  ;;  %v71_v20 = vpack.c.bf16 %v62_v16, %v61_v15  ;;  %v55_v21 = vld [vmem:[%s602_s0 + $0x30] sm:$0xff]  ;;  %v56_v22 = vld [vmem:[%s602_s0 + $0x38] sm:$0xff] }
   0x9   :  { %v63_v23 = vld [vmem:[%s602_s0 + $0x70] sm:$0xff]  ;;  %v64_v24 = vld [vmem:[%s602_s0 + $0x78] sm:$0xff]  ;;  %v68_v25 = vpack.c.bf16 %v56_v22, %v55_v21  ;;  %v33_v29 = vld [vmem:[#allocation2] sm:$0xff] }
   0xa   :  { %405 = vmatmul.mubr.msk.bf16.vlgmr.msra.gmra.mrb[0].mxu0 %vm89_vm1, %v66_v17  ;;  %413 = vmatmul.mubr.msk.bf16.vlgmr.msra.gmra.mrb[0].mxu1 %vm89_vm1, %v70_v18  ;;  %v72_v26 = vpack.c.bf16 %v64_v24, %v63_v23  ;;  %v35_v27 = vld [vmem:[#allocation2 + $0x10] sm:$0xff]  ;;  %v36_v33 = vld [vmem:[#allocation2 + $0x18] sm:$0xff]  ;;  %v34_v39 = vld [vmem:[#allocation2 + $0x8] sm:$0xff] }
   0xb   :  { %408 = vmatprep.mubr.msk.bf16.mxu0 %vm89_vm1, %v67_v19  ;;  %416 = vmatprep.mubr.msk.bf16.mxu1 %vm89_vm1, %v71_v20  ;;  %v39_v51 = vld [vmem:[#allocation2 + $0x30] sm:$0xff]  ;;  %v37_v53 = vld [vmem:[#allocation2 + $0x20] sm:$0xff]  ;;  %v40_v57 = vld [vmem:[#allocation2 + $0x38] sm:$0xff] }
   0xc   :  { %v41_v30 = vld [vmem:[#allocation2 + $0x40] sm:$0xff]  ;;  %v42_v40 = vld [vmem:[#allocation2 + $0x48] sm:$0xff] }
   0xd   :  { %v43_v28 = vld [vmem:[#allocation2 + $0x50] sm:$0xff]  ;;  %v44_v34 = vld [vmem:[#allocation2 + $0x58] sm:$0xff]  ;;  %v38_v63 = vld [vmem:[#allocation2 + $0x28] sm:$0xff] }
   0xe   :  { %v45_v54 = vld [vmem:[#allocation2 + $0x60] sm:$0xff]  ;;  %v46_v0 = vld [vmem:[#allocation2 + $0x68] sm:$0xff] }
   0xf   :  { %v47_v52 = vld [vmem:[#allocation2 + $0x70] sm:$0xff]  ;;  %v48_v58 = vld [vmem:[#allocation2 + $0x78] sm:$0xff] }
  0x12   :  { %409 = vmatmul.mubr.msk.bf16.gmra.mrb[4].mxu0 %vm89_vm1, %v68_v25  ;;  %417 = vmatmul.mubr.msk.bf16.gmra.mrb[4].mxu1 %vm89_vm1, %v72_v26 }
  0xdd   :  { %v406_v31 = vpop.f32.mrb[0].mxu0  ;;  %v414_v32 = vpop.f32.mrb[0].mxu1 }
  0xde   :  { %v213_v35 = vadd.f32 %v406_v31, %v35_v27  ;;  %v221_v36 = vadd.f32 %v414_v32, %v43_v28  ;;  %v148_v37 = vpop.f32.mrb[1].mxu0  ;;  %v180_v38 = vpop.f32.mrb[1].mxu1 }
  0xdf   :  { %v211_v41 = vadd.f32 %v148_v37, %v33_v29  ;;  %v219_v42 = vadd.f32 %v180_v38, %v41_v30  ;;  %v407_v43 = vpop.f32.mrb[2].mxu0  ;;  %v415_v44 = vpop.f32.mrb[2].mxu1 }
  0xe0   :  { %230 = vst.msk [vmem:[#allocation2 + $0x10] sm:$0xff] %vm16_vm0, %v213_v35  ;;  %238 = vst.msk [vmem:[#allocation2 + $0x50] sm:$0xff] %vm16_vm0, %v221_v36  ;;  %v214_v45 = vadd.f32 %v407_v43, %v36_v33  ;;  %v222_v46 = vadd.f32 %v415_v44, %v44_v34  ;;  %v151_v47 = vpop.f32.mrb[3].mxu0  ;;  %v183_v48 = vpop.f32.mrb[3].mxu1 }
  0xe1   :  { %228 = vst.msk [vmem:[#allocation2] sm:$0xff] %vm16_vm0, %v211_v41  ;;  %236 = vst.msk [vmem:[#allocation2 + $0x40] sm:$0xff] %vm16_vm0, %v219_v42  ;;  %v212_v49 = vadd.f32 %v151_v47, %v34_v39  ;;  %v220_v50 = vadd.f32 %v183_v48, %v42_v40 }
  0xe2   :  { %231 = vst.msk [vmem:[#allocation2 + $0x18] sm:$0xff] %vm16_vm0, %v214_v45  ;;  %239 = vst.msk [vmem:[#allocation2 + $0x58] sm:$0xff] %vm16_vm0, %v222_v46 }
  0xe3   :  { %229 = vst.msk [vmem:[#allocation2 + $0x8] sm:$0xff] %vm16_vm0, %v212_v49  ;;  %237 = vst.msk [vmem:[#allocation2 + $0x48] sm:$0xff] %vm16_vm0, %v220_v50 }
  0xe5   :  { %v410_v55 = vpop.f32.mrb[4].mxu0  ;;  %v418_v56 = vpop.f32.mrb[4].mxu1 }
  0xe6   :  { %v217_v59 = vadd.f32 %v410_v55, %v39_v51  ;;  %v225_v60 = vadd.f32 %v418_v56, %v47_v52  ;;  %v164_v61 = vpop.f32.mrb[5].mxu0  ;;  %v196_v62 = vpop.f32.mrb[5].mxu1 }
  0xe7   :  { %v249_v1 = vld [vmem:[#allocation2 + $0x10] sm:$0xff]  ;;  %v215_v3 = vadd.f32 %v164_v61, %v37_v53  ;;  %v223_v4 = vadd.f32 %v196_v62, %v45_v54  ;;  %v411_v5 = vpop.f32.mrb[6].mxu0  ;;  %v419_v6 = vpop.f32.mrb[6].mxu1 }
  0xe8   :  { %v257_v2 = vld [vmem:[#allocation2 + $0x50] sm:$0xff]  ;;  %v376_v7 = vpack.c.bf16 %v249_v1, %v249_v1  ;;  %v247_v9 = vld [vmem:[#allocation2] sm:$0xff]  ;;  %234 = vst.msk [vmem:[#allocation2 + $0x30] sm:$0xff] %vm16_vm0, %v217_v59  ;;  %242 = vst.msk [vmem:[#allocation2 + $0x70] sm:$0xff] %vm16_vm0, %v225_v60  ;;  %v218_v11 = vadd.f32 %v411_v5, %v40_v57  ;;  %v226_v12 = vadd.f32 %v419_v6, %v48_v58  ;;  %v167_v13 = vpop.f32.mrb[7].mxu0  ;;  %v199_v14 = vpop.f32.mrb[7].mxu1 }
  0xe9   :  { %v384_v8 = vpack.c.bf16 %v257_v2, %v257_v2  ;;  %v255_v10 = vld [vmem:[#allocation2 + $0x40] sm:$0xff]  ;;  %v374_v15 = vpack.c.bf16 %v247_v9, %v247_v9  ;;  %v250_v17 = vld [vmem:[#allocation2 + $0x18] sm:$0xff]  ;;  %232 = vst.msk [vmem:[#allocation2 + $0x20] sm:$0xff] %vm16_vm0, %v215_v3  ;;  %240 = vst.msk [vmem:[#allocation2 + $0x60] sm:$0xff] %vm16_vm0, %v223_v4  ;;  %v216_v19 = vadd.f32 %v167_v13, %v38_v63 }
  0xea   :  { %v382_v16 = vpack.c.bf16 %v255_v10, %v255_v10  ;;  %v258_v18 = vld [vmem:[#allocation2 + $0x58] sm:$0xff]  ;;  %v224_v20 = vadd.f32 %v199_v14, %v46_v0  ;;  %330 = vst.msk [vmem:[%s603_s2 + $0x8] sm:$0xf] %vm327_vm2, %v376_v7  ;;  %v377_v21 = vpack.c.bf16 %v250_v17, %v250_v17  ;;  %v248_v23 = vld [vmem:[#allocation2 + $0x8] sm:$0xff] }
  0xeb   :  { %338 = vst.msk [vmem:[%s603_s2 + $0x28] sm:$0xf] %vm327_vm2, %v384_v8  ;;  %v385_v22 = vpack.c.bf16 %v258_v18, %v258_v18  ;;  %v256_v24 = vld [vmem:[#allocation2 + $0x48] sm:$0xff]  ;;  %328 = vst.msk [vmem:[%s603_s2] sm:$0xf] %vm327_vm2, %v374_v15  ;;  %v375_v25 = vpack.c.bf16 %v248_v23, %v248_v23 }
  0xec   :  { %235 = vst.msk [vmem:[#allocation2 + $0x38] sm:$0xff] %vm16_vm0, %v218_v11  ;;  %243 = vst.msk [vmem:[#allocation2 + $0x78] sm:$0xff] %vm16_vm0, %v226_v12  ;;  %v383_v26 = vpack.c.bf16 %v256_v24, %v256_v24 }
  0xed   :  { %336 = vst.msk [vmem:[%s603_s2 + $0x20] sm:$0xf] %vm327_vm2, %v382_v16  ;;  %331 = vst.msk [vmem:[%s603_s2 + $0xc] sm:$0xf] %vm327_vm2, %v377_v21 }
  0xee   :  { %233 = vst.msk [vmem:[#allocation2 + $0x28] sm:$0xff] %vm16_vm0, %v216_v19  ;;  %241 = vst.msk [vmem:[#allocation2 + $0x68] sm:$0xff] %vm16_vm0, %v224_v20 }
  0xef   :  { %339 = vst.msk [vmem:[%s603_s2 + $0x2c] sm:$0xf] %vm327_vm2, %v385_v22  ;;  %329 = vst.msk [vmem:[%s603_s2 + $0x4] sm:$0xf] %vm327_vm2, %v375_v25  ;;  %v253_v27 = vld [vmem:[#allocation2 + $0x30] sm:$0xff] }
  0xf0   :  { %337 = vst.msk [vmem:[%s603_s2 + $0x24] sm:$0xf] %vm327_vm2, %v383_v26  ;;  %v261_v28 = vld [vmem:[#allocation2 + $0x70] sm:$0xff]  ;;  %v380_v29 = vpack.c.bf16 %v253_v27, %v253_v27  ;;  %v251_v31 = vld [vmem:[#allocation2 + $0x20] sm:$0xff] }
  0xf1   :  { %v388_v30 = vpack.c.bf16 %v261_v28, %v261_v28  ;;  %v259_v32 = vld [vmem:[#allocation2 + $0x60] sm:$0xff]  ;;  %v378_v33 = vpack.c.bf16 %v251_v31, %v251_v31 }
  0xf2   :  { %v386_v34 = vpack.c.bf16 %v259_v32, %v259_v32  ;;  %334 = vst.msk [vmem:[%s603_s2 + $0x18] sm:$0xf] %vm327_vm2, %v380_v29 }
  0xf3   :  { %v254_v35 = vld [vmem:[#allocation2 + $0x38] sm:$0xff]  ;;  %342 = vst.msk [vmem:[%s603_s2 + $0x38] sm:$0xf] %vm327_vm2, %v388_v30  ;;  %332 = vst.msk [vmem:[%s603_s2 + $0x10] sm:$0xf] %vm327_vm2, %v378_v33 }
  0xf4   :  { %v262_v36 = vld [vmem:[#allocation2 + $0x78] sm:$0xff]  ;;  %v381_v37 = vpack.c.bf16 %v254_v35, %v254_v35  ;;  %340 = vst.msk [vmem:[%s603_s2 + $0x30] sm:$0xf] %vm327_vm2, %v386_v34 }
  0xf5   :  { %v389_v38 = vpack.c.bf16 %v262_v36, %v262_v36  ;;  %v252_v39 = vld [vmem:[#allocation2 + $0x28] sm:$0xff] }
  0xf6   :  { %v260_v40 = vld [vmem:[#allocation2 + $0x68] sm:$0xff]  ;;  %v379_v41 = vpack.c.bf16 %v252_v39, %v252_v39  ;;  %335 = vst.msk [vmem:[%s603_s2 + $0x1c] sm:$0xf] %vm327_vm2, %v381_v37 }
  0xf7   :  { %v387_v42 = vpack.c.bf16 %v260_v40, %v260_v40  ;;  %343 = vst.msk [vmem:[%s603_s2 + $0x3c] sm:$0xf] %vm327_vm2, %v389_v38 }
  0xf8   :  { %333 = vst.msk [vmem:[%s603_s2 + $0x14] sm:$0xf] %vm327_vm2, %v379_v41 }
  0xf9   :  { %341 = vst.msk [vmem:[%s603_s2 + $0x34] sm:$0xf] %vm327_vm2, %v387_v42 }

</bundles_post_ra>
